<compile_context>
chip_gen: v6e
topology: v6e:2x2x1
jax: 0.10.0
libtpu: 0.0.40
codegen_flags: <defaults>
</compile_context>

<pallas_src>
import jax
import jax.numpy as jnp
from jax.experimental import pallas as pl
from jax.experimental.pallas import tpu as pltpu

LANES = 128


def _round_up(x, m):
    return (x + m - 1) // m * m


def _make_features_kernel(H1, W1, Hp, Wp, KH, KW, C1, R2W):
    """Fused per-image kernel: conv1 matmul -> pool -> im2col -> conv2 matmul."""

    def kernel(im1_ref, w1_ref, b1_ref, w2_ref, b2_ref,
               o1_ref, o2_ref, p1_ref, im2_ref):
        # ---- conv1 + bias + ReLU: one folded-K MXU matmul (bf16 in, f32 acc).
        y1 = jnp.dot(im1_ref[...], w1_ref[...],
                     preferred_element_type=jnp.float32)
        o1_ref[...] = jnp.maximum(y1 + b1_ref[...], 0.0)

        # ---- 2x2 / stride-2 max-pool into a compact (hp*Wp + wp) row layout.
        for hp in range(Hp):
            base = 2 * hp * W1
            p1_ref[pl.ds(hp * Wp, Wp), :] = jnp.maximum(
                jnp.maximum(o1_ref[pl.ds(base, Wp, stride=2), :],
                            o1_ref[pl.ds(base + 1, Wp, stride=2), :]),
                jnp.maximum(o1_ref[pl.ds(base + W1, Wp, stride=2), :],
                            o1_ref[pl.ds(base + W1 + 1, Wp, stride=2), :]))

        # ---- conv2 folded-K im2col: tap (i,j) occupies lanes [t*C1,(t+1)*C1).
        # Zero first so the K padding lanes (>= KH*KW*C1) multiply as exact 0.
        im2_ref[...] = jnp.zeros(im2_ref.shape, im2_ref.dtype)
        for i in range(KH):
            for j in range(KW):
                t = i * KW + j
                im2_ref[pl.ds(0, R2W), pl.ds(t * C1, C1)] = (
                    p1_ref[pl.ds(i * Wp + j, R2W), pl.ds(0, C1)]
                    .astype(im2_ref.dtype))

        # ---- conv2 + bias + ReLU: one (R2W, 512) x (512, 128) MXU matmul.
        y2 = jnp.dot(im2_ref[...], w2_ref[...],
                     preferred_element_type=jnp.float32)
        o2_ref[...] = jnp.maximum(y2 + b2_ref[...], 0.0)

    return kernel


def lenet_features_pallas(params, x_nchw):
    """Fused Pallas forward of LeNet.features; returns [f1, f2] in NCHW."""
    w1, b1 = params["conv1_w"], params["conv1_b"]    # (16,3,5,5), (16,)
    w2, b2 = params["conv2_w"], params["conv2_b"]    # (32,16,5,5), (32,)
    N, Cin, H, W = x_nchw.shape
    C1, _, KH, KW = w1.shape
    C2 = w2.shape[0]
    H1, W1 = H - KH + 1, W - KW + 1                  # conv1 output extent
    Hp, Wp = H1 // 2, W1 // 2                        # after 2x2/stride-2 pool
    H2, W2 = Hp - KH + 1, Wp - KW + 1                # conv2 output extent

    HW1 = H1 * W1                                    # conv1 rows per image
    K1 = _round_up(KH * KW * Cin, LANES)             # folded conv1 K: 75 -> 128
    K2 = KH * KW * C1                                # folded conv2 K: 400
    K2P = _round_up(K2, 2 * LANES)                   # -> 512 (full MXU passes)
    R2W = _round_up((H2 - 1) * Wp + W2, 8)           # conv2 row window / image
    P1R = _round_up(Hp * Wp, 8)                      # pooled rows (scratch)

    assert HW1 % 8 == 0, "conv1 rows per image must be sublane aligned"
    assert (R2W - 1) + (KH - 1) * Wp + (KW - 1) < P1R, \
        "conv2 row window would read past the pooled scratch"

    # Lane-dense folded-K im2col for conv1, built once in the wrapper.
    x_nhwc = jnp.transpose(x_nchw, (0, 2, 3, 1))
    taps = [x_nhwc[:, i:i + H1, j:j + W1, :]
            for i in range(KH) for j in range(KW)]
    im1 = jnp.concatenate(taps, axis=-1).reshape(N * HW1, KH * KW * Cin)
    im1 = jnp.pad(im1, ((0, 0), (0, K1 - KH * KW * Cin))).astype(jnp.bfloat16)

    # conv1 weights: rows ordered (i, j, c) to match the im1 column order.
    w1_mat = jnp.transpose(w1, (2, 3, 1, 0)).reshape(KH * KW * Cin, C1)
    w1_mat = jnp.pad(w1_mat, ((0, K1 - KH * KW * Cin), (0, LANES - C1)))
    w1_mat = w1_mat.astype(jnp.bfloat16)

    # conv2 weights repacked to the folded-K layout: (400 -> 512, 128) bf16.
    w2_mat = jnp.transpose(w2, (2, 3, 1, 0)).reshape(K2, C2)
    w2_mat = jnp.pad(w2_mat, ((0, K2P - K2), (0, LANES - C2)))
    w2_mat = w2_mat.astype(jnp.bfloat16)

    b1_p = jnp.pad(b1, (0, LANES - C1)).reshape(1, LANES).astype(jnp.float32)
    b2_p = jnp.pad(b2, (0, LANES - C2)).reshape(1, LANES).astype(jnp.float32)

    kernel = _make_features_kernel(H1, W1, Hp, Wp, KH, KW, C1, R2W)

    flops = 2 * N * (HW1 * K1 * LANES + R2W * K2P * LANES)
    bytes_accessed = (2 * (im1.size + w1_mat.size + w2_mat.size)
                      + 4 * (b1_p.size + b2_p.size)
                      + 4 * (N * HW1 * LANES + N * R2W * LANES))

    o1_p, o2_p = pl.pallas_call(
        kernel,
        out_shape=(jax.ShapeDtypeStruct((N * HW1, LANES), jnp.float32),
                   jax.ShapeDtypeStruct((N * R2W, LANES), jnp.float32)),
        grid=(N,),
        in_specs=[pl.BlockSpec((HW1, K1), lambda b: (b, 0)),     # im2col(x)
                  pl.BlockSpec((K1, LANES), lambda b: (0, 0)),   # w1 (once)
                  pl.BlockSpec((1, LANES), lambda b: (0, 0)),    # b1
                  pl.BlockSpec((K2P, LANES), lambda b: (0, 0)),  # w2 (once)
                  pl.BlockSpec((1, LANES), lambda b: (0, 0))],   # b2
        out_specs=(pl.BlockSpec((HW1, LANES), lambda b: (b, 0)),
                   pl.BlockSpec((R2W, LANES), lambda b: (b, 0))),
        scratch_shapes=[pltpu.VMEM((P1R, LANES), jnp.float32),
                        pltpu.VMEM((R2W, K2P), jnp.bfloat16)],
        compiler_params=pltpu.CompilerParams(
            dimension_semantics=("parallel",)),   # v7x: 2 TCs split the batch
        cost_estimate=pl.CostEstimate(flops=flops, transcendentals=0,
                                      bytes_accessed=bytes_accessed),
    )(im1, w1_mat, b1_p, w2_mat, b2_p)

    # Slice valid rows / channels back out and return NCHW like PyTorch.
    f1 = o1_p.reshape(N, H1, W1, LANES)[..., :C1]
    f1 = jnp.transpose(f1, (0, 3, 1, 2))

    valid_q = jnp.asarray([ho * Wp + wo for ho in range(H2) for wo in range(W2)],
                          dtype=jnp.int32)
    f2 = o2_p.reshape(N, R2W, LANES)[:, valid_q, :C2].reshape(N, H2, W2, C2)
    f2 = jnp.transpose(f2, (0, 3, 1, 2))
    return [f1, f2]


def init_lenet_params(key):
    ks = jax.random.split(key, 10)

    def u(k, shape, fan_in):
        bound = 1.0 / float(fan_in) ** 0.5
        return jax.random.uniform(k, shape, jnp.float32, -bound, bound)

    return {
        "conv1_w": u(ks[0], (16, 3, 5, 5), 3 * 5 * 5),
        "conv1_b": u(ks[1], (16,), 3 * 5 * 5),
        "conv2_w": u(ks[2], (32, 16, 5, 5), 16 * 5 * 5),
        "conv2_b": u(ks[3], (32,), 16 * 5 * 5),
        # classifier params (unused by forward(); kept for shape fidelity)
        "fc1_w": u(ks[4], (120, 32 * 5 * 5), 32 * 5 * 5),
        "fc1_b": u(ks[5], (120,), 32 * 5 * 5),
        "fc2_w": u(ks[6], (84, 120), 120),
        "fc2_b": u(ks[7], (84,), 120),
        "fc3_w": u(ks[8], (10, 84), 84),
        "fc3_b": u(ks[9], (10,), 84),
    }


def lenet_forward(params, x_nchw):
    """Returns [relu(conv1(x)), relu(conv2(pool(relu(conv1(x)))))] in NCHW."""
    # TODO(synk): the final MaxPool2d ('5') and the classifier do not affect
    # forward()'s returned list, so they are intentionally not computed.
    return lenet_features_pallas(params, x_nchw)


# ------------------------------ reference ------------------------------------

def _ref_forward(params, x_nchw):
    def conv_relu(x, w, b):
        y = jax.lax.conv_general_dilated(
            x, w, window_strides=(1, 1), padding="VALID",
            dimension_numbers=("NCHW", "OIHW", "NCHW"))
        return jax.nn.relu(y + b[None, :, None, None])

    f1 = conv_relu(x_nchw, params["conv1_w"], params["conv1_b"])
    p1 = jax.lax.reduce_window(f1, -jnp.inf, jax.lax.max,
                               window_dimensions=(1, 1, 2, 2),
                               window_strides=(1, 1, 2, 2), padding="VALID")
    f2 = conv_relu(p1, params["conv2_w"], params["conv2_b"])
    return [f1, f2]


if __name__ == "__main__":
    key = jax.random.PRNGKey(0)
    pkey, xkey = jax.random.split(key)
    params = init_lenet_params(pkey)
    x = jax.random.normal(xkey, (2, 3, 16, 16), jnp.float32)   # small NCHW input

    outs = jax.jit(lenet_forward)(params, x)
    outs = jax.block_until_ready(outs)

    refs = _ref_forward(params, x)
    assert outs[0].shape == (2, 16, 12, 12) and outs[1].shape == (2, 32, 2, 2)
    for o, r in zip(outs, refs):
        assert o.shape == r.shape
        # bf16 matmul operands (f32 accumulation) vs. a full-f32 reference.
        err = float(jnp.max(jnp.abs(o - r)))
        assert jnp.allclose(o, r, rtol=2e-2, atol=2e-2), f"max abs err {err}"

    print("KERNEL_OK")
</pallas_src>

<mosaic_0001>
module attributes {stable_mosaic.version = 11 : i64} {
  func.func @kernel(%arg0: i32, %arg1: memref<144x128xbf16, #tpu.memory_space<vmem>>, %arg2: memref<128x128xbf16, #tpu.memory_space<vmem>>, %arg3: memref<1x128xf32, #tpu.memory_space<vmem>>, %arg4: memref<512x128xbf16, #tpu.memory_space<vmem>>, %arg5: memref<1x128xf32, #tpu.memory_space<vmem>>, %arg6: memref<144x128xf32, #tpu.memory_space<vmem>>, %arg7: memref<8x128xf32, #tpu.memory_space<vmem>>, %arg8: memref<40x128xf32, #tpu.memory_space<vmem>>, %arg9: memref<8x512xbf16, #tpu.memory_space<vmem>>) attributes {dimension_semantics = [#tpu.dimension_semantics<parallel>], iteration_bounds = array<i64: 2>, scalar_prefetch = 0 : i64, scratch_operands = 2 : i64, tpu.core_type = #tpu.core_type<tc>, window_params = [{transform_indices = @transform_0, window_bounds = array<i64: 144, 128>}, {pipeline_mode = #tpu.pipeline_mode<synchronous>, transform_indices = @transform_1, window_bounds = array<i64: 128, 128>}, {pipeline_mode = #tpu.pipeline_mode<synchronous>, transform_indices = @transform_2, window_bounds = array<i64: 1, 128>}, {pipeline_mode = #tpu.pipeline_mode<synchronous>, transform_indices = @transform_3, window_bounds = array<i64: 512, 128>}, {pipeline_mode = #tpu.pipeline_mode<synchronous>, transform_indices = @transform_4, window_bounds = array<i64: 1, 128>}, {transform_indices = @transform_5, window_bounds = array<i64: 144, 128>}, {transform_indices = @transform_6, window_bounds = array<i64: 8, 128>}]} {
    %c0 = arith.constant 0 : index
    %c0_0 = arith.constant 0 : index
    %0 = vector.load %arg1[%c0, %c0_0] : memref<144x128xbf16, #tpu.memory_space<vmem>>, vector<144x128xbf16>
    %c0_1 = arith.constant 0 : index
    %c0_2 = arith.constant 0 : index
    %1 = vector.load %arg2[%c0_1, %c0_2] : memref<128x128xbf16, #tpu.memory_space<vmem>>, vector<128x128xbf16>
    %cst = arith.constant dense<0.000000e+00> : vector<144x128xf32>
    %2 = tpu.matmul %0, %1, %cst {dimension_numbers = #tpu.dot_dimension_numbers<[1], [0], [0], [1], [0, 0, 1, 1], [], []>} : vector<144x128xbf16>, vector<128x128xbf16>, vector<144x128xf32> -> vector<144x128xf32>
    %c0_3 = arith.constant 0 : index
    %c0_4 = arith.constant 0 : index
    %3 = vector.load %arg3[%c0_3, %c0_4] : memref<1x128xf32, #tpu.memory_space<vmem>>, vector<1x128xf32>
    %4 = vector.broadcast %3 : vector<1x128xf32> to vector<144x128xf32>
    %5 = arith.addf %2, %4 : vector<144x128xf32>
    %cst_5 = arith.constant 0.000000e+00 : f32
    %6 = vector.broadcast %cst_5 : f32 to vector<144x128xf32>
    %7 = arith.maximumf %5, %6 : vector<144x128xf32>
    %c0_6 = arith.constant 0 : index
    %c0_7 = arith.constant 0 : index
    %8 = vector.load %arg6[%c0_6, %c0_7] : memref<144x128xf32, #tpu.memory_space<vmem>>, vector<144x128xf32>
    tpu.vector_store %arg6[%c0_6, %c0_7], %7 {strides = array<i32>} : memref<144x128xf32, #tpu.memory_space<vmem>>, vector<144x128xf32>,
    %c0_8 = arith.constant 0 : index
    %c0_9 = arith.constant 0 : index
    %9 = tpu.strided_load %arg6[%c0_8, %c0_9] {strides = array<i32: 2, 1>} : memref<144x128xf32, #tpu.memory_space<vmem>>, vector<6x128xf32>
    %c1 = arith.constant 1 : index
    %c0_10 = arith.constant 0 : index
    %10 = tpu.strided_load %arg6[%c1, %c0_10] {strides = array<i32: 2, 1>} : memref<144x128xf32, #tpu.memory_space<vmem>>, vector<6x128xf32>
    %11 = arith.maximumf %9, %10 : vector<6x128xf32>
    %c12 = arith.constant 12 : index
    %c0_11 = arith.constant 0 : index
    %12 = tpu.strided_load %arg6[%c12, %c0_11] {strides = array<i32: 2, 1>} : memref<144x128xf32, #tpu.memory_space<vmem>>, vector<6x128xf32>
    %c13 = arith.constant 13 : index
    %c0_12 = arith.constant 0 : index
    %13 = tpu.strided_load %arg6[%c13, %c0_12] {strides = array<i32: 2, 1>} : memref<144x128xf32, #tpu.memory_space<vmem>>, vector<6x128xf32>
    %14 = arith.maximumf %12, %13 : vector<6x128xf32>
    %15 = arith.maximumf %11, %14 : vector<6x128xf32>
    %c0_13 = arith.constant 0 : index
    %c0_14 = arith.constant 0 : index
    %16 = vector.load %arg8[%c0_13, %c0_14] : memref<40x128xf32, #tpu.memory_space<vmem>>, vector<6x128xf32>
    tpu.vector_store %arg8[%c0_13, %c0_14], %15 {strides = array<i32>} : memref<40x128xf32, #tpu.memory_space<vmem>>, vector<6x128xf32>,
    %c24 = arith.constant 24 : index
    %c0_15 = arith.constant 0 : index
    %17 = tpu.strided_load %arg6[%c24, %c0_15] {strides = array<i32: 2, 1>} : memref<144x128xf32, #tpu.memory_space<vmem>>, vector<6x128xf32>
    %c25 = arith.constant 25 : index
    %c0_16 = arith.constant 0 : index
    %18 = tpu.strided_load %arg6[%c25, %c0_16] {strides = array<i32: 2, 1>} : memref<144x128xf32, #tpu.memory_space<vmem>>, vector<6x128xf32>
    %19 = arith.maximumf %17, %18 : vector<6x128xf32>
    %c36 = arith.constant 36 : index
    %c0_17 = arith.constant 0 : index
    %20 = tpu.strided_load %arg6[%c36, %c0_17] {strides = array<i32: 2, 1>} : memref<144x128xf32, #tpu.memory_space<vmem>>, vector<6x128xf32>
    %c37 = arith.constant 37 : index
    %c0_18 = arith.constant 0 : index
    %21 = tpu.strided_load %arg6[%c37, %c0_18] {strides = array<i32: 2, 1>} : memref<144x128xf32, #tpu.memory_space<vmem>>, vector<6x128xf32>
    %22 = arith.maximumf %20, %21 : vector<6x128xf32>
    %23 = arith.maximumf %19, %22 : vector<6x128xf32>
    %c6 = arith.constant 6 : index
    %c0_19 = arith.constant 0 : index
    %24 = vector.load %arg8[%c6, %c0_19] : memref<40x128xf32, #tpu.memory_space<vmem>>, vector<6x128xf32>
    tpu.vector_store %arg8[%c6, %c0_19], %23 {strides = array<i32>} : memref<40x128xf32, #tpu.memory_space<vmem>>, vector<6x128xf32>,
    %c48 = arith.constant 48 : index
    %c0_20 = arith.constant 0 : index
    %25 = tpu.strided_load %arg6[%c48, %c0_20] {strides = array<i32: 2, 1>} : memref<144x128xf32, #tpu.memory_space<vmem>>, vector<6x128xf32>
    %c49 = arith.constant 49 : index
    %c0_21 = arith.constant 0 : index
    %26 = tpu.strided_load %arg6[%c49, %c0_21] {strides = array<i32: 2, 1>} : memref<144x128xf32, #tpu.memory_space<vmem>>, vector<6x128xf32>
    %27 = arith.maximumf %25, %26 : vector<6x128xf32>
    %c60 = arith.constant 60 : index
    %c0_22 = arith.constant 0 : index
    %28 = tpu.strided_load %arg6[%c60, %c0_22] {strides = array<i32: 2, 1>} : memref<144x128xf32, #tpu.memory_space<vmem>>, vector<6x128xf32>
    %c61 = arith.constant 61 : index
    %c0_23 = arith.constant 0 : index
    %29 = tpu.strided_load %arg6[%c61, %c0_23] {strides = array<i32: 2, 1>} : memref<144x128xf32, #tpu.memory_space<vmem>>, vector<6x128xf32>
    %30 = arith.maximumf %28, %29 : vector<6x128xf32>
    %31 = arith.maximumf %27, %30 : vector<6x128xf32>
    %c12_24 = arith.constant 12 : index
    %c0_25 = arith.constant 0 : index
    %32 = vector.load %arg8[%c12_24, %c0_25] : memref<40x128xf32, #tpu.memory_space<vmem>>, vector<6x128xf32>
    tpu.vector_store %arg8[%c12_24, %c0_25], %31 {strides = array<i32>} : memref<40x128xf32, #tpu.memory_space<vmem>>, vector<6x128xf32>,
    %c72 = arith.constant 72 : index
    %c0_26 = arith.constant 0 : index
    %33 = tpu.strided_load %arg6[%c72, %c0_26] {strides = array<i32: 2, 1>} : memref<144x128xf32, #tpu.memory_space<vmem>>, vector<6x128xf32>
    %c73 = arith.constant 73 : index
    %c0_27 = arith.constant 0 : index
    %34 = tpu.strided_load %arg6[%c73, %c0_27] {strides = array<i32: 2, 1>} : memref<144x128xf32, #tpu.memory_space<vmem>>, vector<6x128xf32>
    %35 = arith.maximumf %33, %34 : vector<6x128xf32>
    %c84 = arith.constant 84 : index
    %c0_28 = arith.constant 0 : index
    %36 = tpu.strided_load %arg6[%c84, %c0_28] {strides = array<i32: 2, 1>} : memref<144x128xf32, #tpu.memory_space<vmem>>, vector<6x128xf32>
    %c85 = arith.constant 85 : index
    %c0_29 = arith.constant 0 : index
    %37 = tpu.strided_load %arg6[%c85, %c0_29] {strides = array<i32: 2, 1>} : memref<144x128xf32, #tpu.memory_space<vmem>>, vector<6x128xf32>
    %38 = arith.maximumf %36, %37 : vector<6x128xf32>
    %39 = arith.maximumf %35, %38 : vector<6x128xf32>
    %c18 = arith.constant 18 : index
    %c0_30 = arith.constant 0 : index
    %40 = vector.load %arg8[%c18, %c0_30] : memref<40x128xf32, #tpu.memory_space<vmem>>, vector<6x128xf32>
    tpu.vector_store %arg8[%c18, %c0_30], %39 {strides = array<i32>} : memref<40x128xf32, #tpu.memory_space<vmem>>, vector<6x128xf32>,
    %c96 = arith.constant 96 : index
    %c0_31 = arith.constant 0 : index
    %41 = tpu.strided_load %arg6[%c96, %c0_31] {strides = array<i32: 2, 1>} : memref<144x128xf32, #tpu.memory_space<vmem>>, vector<6x128xf32>
    %c97 = arith.constant 97 : index
    %c0_32 = arith.constant 0 : index
    %42 = tpu.strided_load %arg6[%c97, %c0_32] {strides = array<i32: 2, 1>} : memref<144x128xf32, #tpu.memory_space<vmem>>, vector<6x128xf32>
    %43 = arith.maximumf %41, %42 : vector<6x128xf32>
    %c108 = arith.constant 108 : index
    %c0_33 = arith.constant 0 : index
    %44 = tpu.strided_load %arg6[%c108, %c0_33] {strides = array<i32: 2, 1>} : memref<144x128xf32, #tpu.memory_space<vmem>>, vector<6x128xf32>
    %c109 = arith.constant 109 : index
    %c0_34 = arith.constant 0 : index
    %45 = tpu.strided_load %arg6[%c109, %c0_34] {strides = array<i32: 2, 1>} : memref<144x128xf32, #tpu.memory_space<vmem>>, vector<6x128xf32>
    %46 = arith.maximumf %44, %45 : vector<6x128xf32>
    %47 = arith.maximumf %43, %46 : vector<6x128xf32>
    %c24_35 = arith.constant 24 : index
    %c0_36 = arith.constant 0 : index
    %48 = vector.load %arg8[%c24_35, %c0_36] : memref<40x128xf32, #tpu.memory_space<vmem>>, vector<6x128xf32>
    tpu.vector_store %arg8[%c24_35, %c0_36], %47 {strides = array<i32>} : memref<40x128xf32, #tpu.memory_space<vmem>>, vector<6x128xf32>,
    %c120 = arith.constant 120 : index
    %c0_37 = arith.constant 0 : index
    %49 = tpu.strided_load %arg6[%c120, %c0_37] {strides = array<i32: 2, 1>} : memref<144x128xf32, #tpu.memory_space<vmem>>, vector<6x128xf32>
    %c121 = arith.constant 121 : index
    %c0_38 = arith.constant 0 : index
    %50 = tpu.strided_load %arg6[%c121, %c0_38] {strides = array<i32: 2, 1>} : memref<144x128xf32, #tpu.memory_space<vmem>>, vector<6x128xf32>
    %51 = arith.maximumf %49, %50 : vector<6x128xf32>
    %c132 = arith.constant 132 : index
    %c0_39 = arith.constant 0 : index
    %52 = tpu.strided_load %arg6[%c132, %c0_39] {strides = array<i32: 2, 1>} : memref<144x128xf32, #tpu.memory_space<vmem>>, vector<6x128xf32>
    %c133 = arith.constant 133 : index
    %c0_40 = arith.constant 0 : index
    %53 = tpu.strided_load %arg6[%c133, %c0_40] {strides = array<i32: 2, 1>} : memref<144x128xf32, #tpu.memory_space<vmem>>, vector<6x128xf32>
    %54 = arith.maximumf %52, %53 : vector<6x128xf32>
    %55 = arith.maximumf %51, %54 : vector<6x128xf32>
    %c30 = arith.constant 30 : index
    %c0_41 = arith.constant 0 : index
    %56 = vector.load %arg8[%c30, %c0_41] : memref<40x128xf32, #tpu.memory_space<vmem>>, vector<6x128xf32>
    tpu.vector_store %arg8[%c30, %c0_41], %55 {strides = array<i32>} : memref<40x128xf32, #tpu.memory_space<vmem>>, vector<6x128xf32>,
    %cst_42 = arith.constant 0.000000e+00 : bf16
    %57 = vector.broadcast %cst_42 : bf16 to vector<8x512xbf16>
    %c0_43 = arith.constant 0 : index
    %c0_44 = arith.constant 0 : index
    %58 = vector.load %arg9[%c0_43, %c0_44] : memref<8x512xbf16, #tpu.memory_space<vmem>>, vector<8x512xbf16>
    tpu.vector_store %arg9[%c0_43, %c0_44], %57 {strides = array<i32>} : memref<8x512xbf16, #tpu.memory_space<vmem>>, vector<8x512xbf16>,
    %c0_45 = arith.constant 0 : index
    %c0_46 = arith.constant 0 : index
    %59 = vector.load %arg8[%c0_45, %c0_46] : memref<40x128xf32, #tpu.memory_space<vmem>>, vector<8x16xf32>
    %60 = arith.truncf %59 : vector<8x16xf32> to vector<8x16xbf16>
    %c0_47 = arith.constant 0 : index
    %c0_48 = arith.constant 0 : index
    %61 = vector.load %arg9[%c0_47, %c0_48] : memref<8x512xbf16, #tpu.memory_space<vmem>>, vector<8x16xbf16>
    tpu.vector_store %arg9[%c0_47, %c0_48], %60 {strides = array<i32>} : memref<8x512xbf16, #tpu.memory_space<vmem>>, vector<8x16xbf16>,
    %c1_49 = arith.constant 1 : index
    %c0_50 = arith.constant 0 : index
    %62 = vector.load %arg8[%c1_49, %c0_50] : memref<40x128xf32, #tpu.memory_space<vmem>>, vector<8x16xf32>
    %63 = arith.truncf %62 : vector<8x16xf32> to vector<8x16xbf16>
    %c0_51 = arith.constant 0 : index
    %c16 = arith.constant 16 : index
    %64 = vector.load %arg9[%c0_51, %c16] : memref<8x512xbf16, #tpu.memory_space<vmem>>, vector<8x16xbf16>
    tpu.vector_store %arg9[%c0_51, %c16], %63 {strides = array<i32>} : memref<8x512xbf16, #tpu.memory_space<vmem>>, vector<8x16xbf16>,
    %c2 = arith.constant 2 : index
    %c0_52 = arith.constant 0 : index
    %65 = vector.load %arg8[%c2, %c0_52] : memref<40x128xf32, #tpu.memory_space<vmem>>, vector<8x16xf32>
    %66 = arith.truncf %65 : vector<8x16xf32> to vector<8x16xbf16>
    %c0_53 = arith.constant 0 : index
    %c32 = arith.constant 32 : index
    %67 = vector.load %arg9[%c0_53, %c32] : memref<8x512xbf16, #tpu.memory_space<vmem>>, vector<8x16xbf16>
    tpu.vector_store %arg9[%c0_53, %c32], %66 {strides = array<i32>} : memref<8x512xbf16, #tpu.memory_space<vmem>>, vector<8x16xbf16>,
    %c3 = arith.constant 3 : index
    %c0_54 = arith.constant 0 : index
    %68 = vector.load %arg8[%c3, %c0_54] : memref<40x128xf32, #tpu.memory_space<vmem>>, vector<8x16xf32>
    %69 = arith.truncf %68 : vector<8x16xf32> to vector<8x16xbf16>
    %c0_55 = arith.constant 0 : index
    %c48_56 = arith.constant 48 : index
    %70 = vector.load %arg9[%c0_55, %c48_56] : memref<8x512xbf16, #tpu.memory_space<vmem>>, vector<8x16xbf16>
    tpu.vector_store %arg9[%c0_55, %c48_56], %69 {strides = array<i32>} : memref<8x512xbf16, #tpu.memory_space<vmem>>, vector<8x16xbf16>,
    %c4 = arith.constant 4 : index
    %c0_57 = arith.constant 0 : index
    %71 = vector.load %arg8[%c4, %c0_57] : memref<40x128xf32, #tpu.memory_space<vmem>>, vector<8x16xf32>
    %72 = arith.truncf %71 : vector<8x16xf32> to vector<8x16xbf16>
    %c0_58 = arith.constant 0 : index
    %c64 = arith.constant 64 : index
    %73 = vector.load %arg9[%c0_58, %c64] : memref<8x512xbf16, #tpu.memory_space<vmem>>, vector<8x16xbf16>
    tpu.vector_store %arg9[%c0_58, %c64], %72 {strides = array<i32>} : memref<8x512xbf16, #tpu.memory_space<vmem>>, vector<8x16xbf16>,
    %c6_59 = arith.constant 6 : index
    %c0_60 = arith.constant 0 : index
    %74 = vector.load %arg8[%c6_59, %c0_60] : memref<40x128xf32, #tpu.memory_space<vmem>>, vector<8x16xf32>
    %75 = arith.truncf %74 : vector<8x16xf32> to vector<8x16xbf16>
    %c0_61 = arith.constant 0 : index
    %c80 = arith.constant 80 : index
    %76 = vector.load %arg9[%c0_61, %c80] : memref<8x512xbf16, #tpu.memory_space<vmem>>, vector<8x16xbf16>
    tpu.vector_store %arg9[%c0_61, %c80], %75 {strides = array<i32>} : memref<8x512xbf16, #tpu.memory_space<vmem>>, vector<8x16xbf16>,
    %c7 = arith.constant 7 : index
    %c0_62 = arith.constant 0 : index
    %77 = vector.load %arg8[%c7, %c0_62] : memref<40x128xf32, #tpu.memory_space<vmem>>, vector<8x16xf32>
    %78 = arith.truncf %77 : vector<8x16xf32> to vector<8x16xbf16>
    %c0_63 = arith.constant 0 : index
    %c96_64 = arith.constant 96 : index
    %79 = vector.load %arg9[%c0_63, %c96_64] : memref<8x512xbf16, #tpu.memory_space<vmem>>, vector<8x16xbf16>
    tpu.vector_store %arg9[%c0_63, %c96_64], %78 {strides = array<i32>} : memref<8x512xbf16, #tpu.memory_space<vmem>>, vector<8x16xbf16>,
    %c8 = arith.constant 8 : index
    %c0_65 = arith.constant 0 : index
    %80 = vector.load %arg8[%c8, %c0_65] : memref<40x128xf32, #tpu.memory_space<vmem>>, vector<8x16xf32>
    %81 = arith.truncf %80 : vector<8x16xf32> to vector<8x16xbf16>
    %c0_66 = arith.constant 0 : index
    %c112 = arith.constant 112 : index
    %82 = vector.load %arg9[%c0_66, %c112] : memref<8x512xbf16, #tpu.memory_space<vmem>>, vector<8x16xbf16>
    tpu.vector_store %arg9[%c0_66, %c112], %81 {strides = array<i32>} : memref<8x512xbf16, #tpu.memory_space<vmem>>, vector<8x16xbf16>,
    %c9 = arith.constant 9 : index
    %c0_67 = arith.constant 0 : index
    %83 = vector.load %arg8[%c9, %c0_67] : memref<40x128xf32, #tpu.memory_space<vmem>>, vector<8x16xf32>
    %84 = arith.truncf %83 : vector<8x16xf32> to vector<8x16xbf16>
    %c0_68 = arith.constant 0 : index
    %c128 = arith.constant 128 : index
    %85 = vector.load %arg9[%c0_68, %c128] : memref<8x512xbf16, #tpu.memory_space<vmem>>, vector<8x16xbf16>
    tpu.vector_store %arg9[%c0_68, %c128], %84 {strides = array<i32>} : memref<8x512xbf16, #tpu.memory_space<vmem>>, vector<8x16xbf16>,
    %c10 = arith.constant 10 : index
    %c0_69 = arith.constant 0 : index
    %86 = vector.load %arg8[%c10, %c0_69] : memref<40x128xf32, #tpu.memory_space<vmem>>, vector<8x16xf32>
    %87 = arith.truncf %86 : vector<8x16xf32> to vector<8x16xbf16>
    %c0_70 = arith.constant 0 : index
    %c144 = arith.constant 144 : index
    %88 = vector.load %arg9[%c0_70, %c144] : memref<8x512xbf16, #tpu.memory_space<vmem>>, vector<8x16xbf16>
    tpu.vector_store %arg9[%c0_70, %c144], %87 {strides = array<i32>} : memref<8x512xbf16, #tpu.memory_space<vmem>>, vector<8x16xbf16>,
    %c12_71 = arith.constant 12 : index
    %c0_72 = arith.constant 0 : index
    %89 = vector.load %arg8[%c12_71, %c0_72] : memref<40x128xf32, #tpu.memory_space<vmem>>, vector<8x16xf32>
    %90 = arith.truncf %89 : vector<8x16xf32> to vector<8x16xbf16>
    %c0_73 = arith.constant 0 : index
    %c160 = arith.constant 160 : index
    %91 = vector.load %arg9[%c0_73, %c160] : memref<8x512xbf16, #tpu.memory_space<vmem>>, vector<8x16xbf16>
    tpu.vector_store %arg9[%c0_73, %c160], %90 {strides = array<i32>} : memref<8x512xbf16, #tpu.memory_space<vmem>>, vector<8x16xbf16>,
    %c13_74 = arith.constant 13 : index
    %c0_75 = arith.constant 0 : index
    %92 = vector.load %arg8[%c13_74, %c0_75] : memref<40x128xf32, #tpu.memory_space<vmem>>, vector<8x16xf32>
    %93 = arith.truncf %92 : vector<8x16xf32> to vector<8x16xbf16>
    %c0_76 = arith.constant 0 : index
    %c176 = arith.constant 176 : index
    %94 = vector.load %arg9[%c0_76, %c176] : memref<8x512xbf16, #tpu.memory_space<vmem>>, vector<8x16xbf16>
    tpu.vector_store %arg9[%c0_76, %c176], %93 {strides = array<i32>} : memref<8x512xbf16, #tpu.memory_space<vmem>>, vector<8x16xbf16>,
    %c14 = arith.constant 14 : index
    %c0_77 = arith.constant 0 : index
    %95 = vector.load %arg8[%c14, %c0_77] : memref<40x128xf32, #tpu.memory_space<vmem>>, vector<8x16xf32>
    %96 = arith.truncf %95 : vector<8x16xf32> to vector<8x16xbf16>
    %c0_78 = arith.constant 0 : index
    %c192 = arith.constant 192 : index
    %97 = vector.load %arg9[%c0_78, %c192] : memref<8x512xbf16, #tpu.memory_space<vmem>>, vector<8x16xbf16>
    tpu.vector_store %arg9[%c0_78, %c192], %96 {strides = array<i32>} : memref<8x512xbf16, #tpu.memory_space<vmem>>, vector<8x16xbf16>,
    %c15 = arith.constant 15 : index
    %c0_79 = arith.constant 0 : index
    %98 = vector.load %arg8[%c15, %c0_79] : memref<40x128xf32, #tpu.memory_space<vmem>>, vector<8x16xf32>
    %99 = arith.truncf %98 : vector<8x16xf32> to vector<8x16xbf16>
    %c0_80 = arith.constant 0 : index
    %c208 = arith.constant 208 : index
    %100 = vector.load %arg9[%c0_80, %c208] : memref<8x512xbf16, #tpu.memory_space<vmem>>, vector<8x16xbf16>
    tpu.vector_store %arg9[%c0_80, %c208], %99 {strides = array<i32>} : memref<8x512xbf16, #tpu.memory_space<vmem>>, vector<8x16xbf16>,
    %c16_81 = arith.constant 16 : index
    %c0_82 = arith.constant 0 : index
    %101 = vector.load %arg8[%c16_81, %c0_82] : memref<40x128xf32, #tpu.memory_space<vmem>>, vector<8x16xf32>
    %102 = arith.truncf %101 : vector<8x16xf32> to vector<8x16xbf16>
    %c0_83 = arith.constant 0 : index
    %c224 = arith.constant 224 : index
    %103 = vector.load %arg9[%c0_83, %c224] : memref<8x512xbf16, #tpu.memory_space<vmem>>, vector<8x16xbf16>
    tpu.vector_store %arg9[%c0_83, %c224], %102 {strides = array<i32>} : memref<8x512xbf16, #tpu.memory_space<vmem>>, vector<8x16xbf16>,
    %c18_84 = arith.constant 18 : index
    %c0_85 = arith.constant 0 : index
    %104 = vector.load %arg8[%c18_84, %c0_85] : memref<40x128xf32, #tpu.memory_space<vmem>>, vector<8x16xf32>
    %105 = arith.truncf %104 : vector<8x16xf32> to vector<8x16xbf16>
    %c0_86 = arith.constant 0 : index
    %c240 = arith.constant 240 : index
    %106 = vector.load %arg9[%c0_86, %c240] : memref<8x512xbf16, #tpu.memory_space<vmem>>, vector<8x16xbf16>
    tpu.vector_store %arg9[%c0_86, %c240], %105 {strides = array<i32>} : memref<8x512xbf16, #tpu.memory_space<vmem>>, vector<8x16xbf16>,
    %c19 = arith.constant 19 : index
    %c0_87 = arith.constant 0 : index
    %107 = vector.load %arg8[%c19, %c0_87] : memref<40x128xf32, #tpu.memory_space<vmem>>, vector<8x16xf32>
    %108 = arith.truncf %107 : vector<8x16xf32> to vector<8x16xbf16>
    %c0_88 = arith.constant 0 : index
    %c256 = arith.constant 256 : index
    %109 = vector.load %arg9[%c0_88, %c256] : memref<8x512xbf16, #tpu.memory_space<vmem>>, vector<8x16xbf16>
    tpu.vector_store %arg9[%c0_88, %c256], %108 {strides = array<i32>} : memref<8x512xbf16, #tpu.memory_space<vmem>>, vector<8x16xbf16>,
    %c20 = arith.constant 20 : index
    %c0_89 = arith.constant 0 : index
    %110 = vector.load %arg8[%c20, %c0_89] : memref<40x128xf32, #tpu.memory_space<vmem>>, vector<8x16xf32>
    %111 = arith.truncf %110 : vector<8x16xf32> to vector<8x16xbf16>
    %c0_90 = arith.constant 0 : index
    %c272 = arith.constant 272 : index
    %112 = vector.load %arg9[%c0_90, %c272] : memref<8x512xbf16, #tpu.memory_space<vmem>>, vector<8x16xbf16>
    tpu.vector_store %arg9[%c0_90, %c272], %111 {strides = array<i32>} : memref<8x512xbf16, #tpu.memory_space<vmem>>, vector<8x16xbf16>,
    %c21 = arith.constant 21 : index
    %c0_91 = arith.constant 0 : index
    %113 = vector.load %arg8[%c21, %c0_91] : memref<40x128xf32, #tpu.memory_space<vmem>>, vector<8x16xf32>
    %114 = arith.truncf %113 : vector<8x16xf32> to vector<8x16xbf16>
    %c0_92 = arith.constant 0 : index
    %c288 = arith.constant 288 : index
    %115 = vector.load %arg9[%c0_92, %c288] : memref<8x512xbf16, #tpu.memory_space<vmem>>, vector<8x16xbf16>
    tpu.vector_store %arg9[%c0_92, %c288], %114 {strides = array<i32>} : memref<8x512xbf16, #tpu.memory_space<vmem>>, vector<8x16xbf16>,
    %c22 = arith.constant 22 : index
    %c0_93 = arith.constant 0 : index
    %116 = vector.load %arg8[%c22, %c0_93] : memref<40x128xf32, #tpu.memory_space<vmem>>, vector<8x16xf32>
    %117 = arith.truncf %116 : vector<8x16xf32> to vector<8x16xbf16>
    %c0_94 = arith.constant 0 : index
    %c304 = arith.constant 304 : index
    %118 = vector.load %arg9[%c0_94, %c304] : memref<8x512xbf16, #tpu.memory_space<vmem>>, vector<8x16xbf16>
    tpu.vector_store %arg9[%c0_94, %c304], %117 {strides = array<i32>} : memref<8x512xbf16, #tpu.memory_space<vmem>>, vector<8x16xbf16>,
    %c24_95 = arith.constant 24 : index
    %c0_96 = arith.constant 0 : index
    %119 = vector.load %arg8[%c24_95, %c0_96] : memref<40x128xf32, #tpu.memory_space<vmem>>, vector<8x16xf32>
    %120 = arith.truncf %119 : vector<8x16xf32> to vector<8x16xbf16>
    %c0_97 = arith.constant 0 : index
    %c320 = arith.constant 320 : index
    %121 = vector.load %arg9[%c0_97, %c320] : memref<8x512xbf16, #tpu.memory_space<vmem>>, vector<8x16xbf16>
    tpu.vector_store %arg9[%c0_97, %c320], %120 {strides = array<i32>} : memref<8x512xbf16, #tpu.memory_space<vmem>>, vector<8x16xbf16>,
    %c25_98 = arith.constant 25 : index
    %c0_99 = arith.constant 0 : index
    %122 = vector.load %arg8[%c25_98, %c0_99] : memref<40x128xf32, #tpu.memory_space<vmem>>, vector<8x16xf32>
    %123 = arith.truncf %122 : vector<8x16xf32> to vector<8x16xbf16>
    %c0_100 = arith.constant 0 : index
    %c336 = arith.constant 336 : index
    %124 = vector.load %arg9[%c0_100, %c336] : memref<8x512xbf16, #tpu.memory_space<vmem>>, vector<8x16xbf16>
    tpu.vector_store %arg9[%c0_100, %c336], %123 {strides = array<i32>} : memref<8x512xbf16, #tpu.memory_space<vmem>>, vector<8x16xbf16>,
    %c26 = arith.constant 26 : index
    %c0_101 = arith.constant 0 : index
    %125 = vector.load %arg8[%c26, %c0_101] : memref<40x128xf32, #tpu.memory_space<vmem>>, vector<8x16xf32>
    %126 = arith.truncf %125 : vector<8x16xf32> to vector<8x16xbf16>
    %c0_102 = arith.constant 0 : index
    %c352 = arith.constant 352 : index
    %127 = vector.load %arg9[%c0_102, %c352] : memref<8x512xbf16, #tpu.memory_space<vmem>>, vector<8x16xbf16>
    tpu.vector_store %arg9[%c0_102, %c352], %126 {strides = array<i32>} : memref<8x512xbf16, #tpu.memory_space<vmem>>, vector<8x16xbf16>,
    %c27 = arith.constant 27 : index
    %c0_103 = arith.constant 0 : index
    %128 = vector.load %arg8[%c27, %c0_103] : memref<40x128xf32, #tpu.memory_space<vmem>>, vector<8x16xf32>
    %129 = arith.truncf %128 : vector<8x16xf32> to vector<8x16xbf16>
    %c0_104 = arith.constant 0 : index
    %c368 = arith.constant 368 : index
    %130 = vector.load %arg9[%c0_104, %c368] : memref<8x512xbf16, #tpu.memory_space<vmem>>, vector<8x16xbf16>
    tpu.vector_store %arg9[%c0_104, %c368], %129 {strides = array<i32>} : memref<8x512xbf16, #tpu.memory_space<vmem>>, vector<8x16xbf16>,
    %c28 = arith.constant 28 : index
    %c0_105 = arith.constant 0 : index
    %131 = vector.load %arg8[%c28, %c0_105] : memref<40x128xf32, #tpu.memory_space<vmem>>, vector<8x16xf32>
    %132 = arith.truncf %131 : vector<8x16xf32> to vector<8x16xbf16>
    %c0_106 = arith.constant 0 : index
    %c384 = arith.constant 384 : index
    %133 = vector.load %arg9[%c0_106, %c384] : memref<8x512xbf16, #tpu.memory_space<vmem>>, vector<8x16xbf16>
    tpu.vector_store %arg9[%c0_106, %c384], %132 {strides = array<i32>} : memref<8x512xbf16, #tpu.memory_space<vmem>>, vector<8x16xbf16>,
    %c0_107 = arith.constant 0 : index
    %c0_108 = arith.constant 0 : index
    %134 = vector.load %arg9[%c0_107, %c0_108] : memref<8x512xbf16, #tpu.memory_space<vmem>>, vector<8x512xbf16>
    %c0_109 = arith.constant 0 : index
    %c0_110 = arith.constant 0 : index
    %135 = vector.load %arg4[%c0_109, %c0_110] : memref<512x128xbf16, #tpu.memory_space<vmem>>, vector<512x128xbf16>
    %cst_111 = arith.constant dense<0.000000e+00> : vector<8x128xf32>
    %136 = tpu.matmul %134, %135, %cst_111 {dimension_numbers = #tpu.dot_dimension_numbers<[1], [0], [0], [1], [0, 0, 1, 1], [], []>} : vector<8x512xbf16>, vector<512x128xbf16>, vector<8x128xf32> -> vector<8x128xf32>
    %c0_112 = arith.constant 0 : index
    %c0_113 = arith.constant 0 : index
    %137 = vector.load %arg5[%c0_112, %c0_113] : memref<1x128xf32, #tpu.memory_space<vmem>>, vector<1x128xf32>
    %138 = vector.broadcast %137 : vector<1x128xf32> to vector<8x128xf32>
    %139 = arith.addf %136, %138 : vector<8x128xf32>
    %cst_114 = arith.constant 0.000000e+00 : f32
    %140 = vector.broadcast %cst_114 : f32 to vector<8x128xf32>
    %141 = arith.maximumf %139, %140 : vector<8x128xf32>
    %c0_115 = arith.constant 0 : index
    %c0_116 = arith.constant 0 : index
    %142 = vector.load %arg7[%c0_115, %c0_116] : memref<8x128xf32, #tpu.memory_space<vmem>>, vector<8x128xf32>
    tpu.vector_store %arg7[%c0_115, %c0_116], %141 {strides = array<i32>} : memref<8x128xf32, #tpu.memory_space<vmem>>, vector<8x128xf32>,
    return
  }
  func.func @transform_0(%arg0: i32) -> (i32, i32) {
    %c0_i32 = arith.constant 0 : i32
    %c0_i32_0 = arith.constant 0 : i32
    return %arg0, %c0_i32 : i32, i32
  }
  func.func @transform_1(%arg0: i32) -> (i32, i32) {
    %c0_i32 = arith.constant 0 : i32
    %c0_i32_0 = arith.constant 0 : i32
    %c0_i32_1 = arith.constant 0 : i32
    return %c0_i32, %c0_i32_0 : i32, i32
  }
  func.func @transform_2(%arg0: i32) -> (i32, i32) {
    %c0_i32 = arith.constant 0 : i32
    %c0_i32_0 = arith.constant 0 : i32
    %c0_i32_1 = arith.constant 0 : i32
    return %c0_i32, %c0_i32_0 : i32, i32
  }
  func.func @transform_3(%arg0: i32) -> (i32, i32) {
    %c0_i32 = arith.constant 0 : i32
    %c0_i32_0 = arith.constant 0 : i32
    %c0_i32_1 = arith.constant 0 : i32
    return %c0_i32, %c0_i32_0 : i32, i32
  }
  func.func @transform_4(%arg0: i32) -> (i32, i32) {
    %c0_i32 = arith.constant 0 : i32
    %c0_i32_0 = arith.constant 0 : i32
    %c0_i32_1 = arith.constant 0 : i32
    return %c0_i32, %c0_i32_0 : i32, i32
  }
  func.func @transform_5(%arg0: i32) -> (i32, i32) {
    %c0_i32 = arith.constant 0 : i32
    %c0_i32_0 = arith.constant 0 : i32
    return %arg0, %c0_i32 : i32, i32
  }
  func.func @transform_6(%arg0: i32) -> (i32, i32) {
    %c0_i32 = arith.constant 0 : i32
    %c0_i32_0 = arith.constant 0 : i32
    return %arg0, %c0_i32 : i32, i32
  }
}

</mosaic_0001>

<bundles_post_ra>
// kernel: lenet_forward.1
= control target key start
LH: loop header
LB: loop body
LE: loop exit
PB: predicated region body
PF: predicated region fallthrough
CT: control target
= control target key end

     0   :  { %s1648_s21 = smov 0   ;;  %s1933_s0 = inlined_call_operand.vmem [shape: bf16[288,128], index: 0, kind: input, shape index: {}]   ;;  %s1934_s1 = inlined_call_operand.vmem [shape: bf16[128,128], index: 1, kind: input, shape index: {}]   ;;  %s1935_s2 = inlined_call_operand.vmem [shape: f32[1,128], index: 2, kind: input, shape index: {}]   ;;  %s1936_s3 = inlined_call_operand.vmem [shape: bf16[512,128], index: 3, kind: input, shape index: {}]   ;;  %s1937_s4 = inlined_call_operand.vmem [shape: f32[1,128], index: 4, kind: input, shape index: {}]   ;;  %s1938_s5 = inlined_call_operand.vmem [shape: f32[288,128], index: 5, kind: output, shape index: {0}]   ;;  %s1939_s6 = inlined_call_operand.vmem [shape: f32[16,128], index: 6, kind: output, shape index: {1}]  }
   0x1 LB: > { %s1654_s22 = sadd.s32 4294967295, %s1601_s21   ;;  %p1285_p0 = scmp.ge.s32.totalorder %s1601_s21, 1  ;;  %s1601_s21 = sphi %s1648_s21, %s17_s21  }
   0x2   : > { %p216_p1 = scmp.lt.s32.totalorder %s1601_s21, 3 }
   0x4   : > { %p217_p2 = pnand %p1285_p0, %p216_p1 }
   0x5   : > { %s250_s27 = smul.u32 (!%p217_p2), 18, %s1654_s22  ;;  %s1607_s29 = smov (!%p217_p2), 16  }
   0x6   : > { %220 = sbr.rel (%p217_p2) target bundleno = 688 (0x2b0), region = 40  ;;  %s1609_s11 = smov (!%p217_p2), 64  }
   0x7   : > { %p251_p3 = scmp.lt.s32.totalorder (!%p217_p2), %s250_s27, 35  ;;  %s1610_s20 = smov (!%p217_p2), 80  }
   0x8   : > { %s1611_s7 = smov (!%p217_p2), 96   ;;  %s1612_s13 = smov (!%p217_p2), 112  }
   0x9   : > { %p262_p4 = scmp.lt.s32.totalorder (!%p217_p2), %s1654_s22, 1 }
   0xb   : > { %v1542_v0 = vld [vmem:[%s1934_s1 + $0x38] sm:$0xff]   ;;  %v1603_v1 = vmov 0.0   ;;  %v1543_v2 = vld [vmem:[%s1934_s1 + $0x30] sm:$0xff]   ;;  %vm1604_vm0 = vmmov 0   ;;  %v1544_v3 = vld [vmem:[%s1934_s1 + $0x28] sm:$0xff]   ;;  %s1941_s27 = smov (!%p251_p3, %s250_s27), 35 }
   0xc   : > { %1472 = vmatprep.subr.bf16.mxu0 %v1603_v1  ;;  %1488 = vmatprep.mubr.msk.bf16.mxu0 %vm1604_vm0, %v1603_v1  ;;  %s1286_s30 = sshll.u32 %s1941_s27, 2  ;;  %v1545_v4 = vld [vmem:[%s1934_s1 + $0x20] sm:$0xff]   ;;  %v1546_v5 = vld [vmem:[%s1934_s1 + $0x18] sm:$0xff]   ;;  %v1547_v6 = vld [vmem:[%s1934_s1 + $0x10] sm:$0xff]   ;;  %v1605_v18 = vmov 0   ;;  %s1287_s24 = sshll.u32 %s1941_s27, 3 }
   0xd   : > { %1473 = vmatpush3.bf16.msra.mxu0 %v1542_v0  ;;  %s1675_s9 = scalar_lea.vmem %s1933_s0, %s1286_s30  ;;  %v1548_v7 = vld [vmem:[%s1934_s1 + $0x8] sm:$0xff]   ;;  %v1549_v8 = vld [vmem:[%s1934_s1] sm:$0xff]   ;;  %622 = vst [vmem:[#allocation3] sm:$0xff] %v1605_v18  ;;  %623 = vst [vmem:[#allocation3 + $0x8] sm:$0xff] %v1605_v18  ;;  %s1719_s28 = scalar_lea.vmem %s1938_s5, %s1287_s24  ;;  %vm626_vm1 = vcmask 125952   ;;  %vm636_vm2 = vcmask 257152  }
   0xe   : > { %1474 = vmatprep.subr.bf16.mxu0 %v1603_v1  ;;  %v1550_v9 = vld [vmem:[%s1675_s9] sm:$0xff]   ;;  %v1551_v10 = vld [vmem:[%s1675_s9 + $0x8] sm:$0xff]   ;;  %v1552_v11 = vld [vmem:[%s1675_s9 + $0x10] sm:$0xff]   ;;  %s1606_s27 = smov 32   ;;  %s1608_s30 = smov 48   ;;  %vm646_vm3 = vcmask 388352  }
   0xf   : > { %v1553_v12 = vld [vmem:[%s1675_s9 + $0x18] sm:$0xff]   ;;  %v1554_v13 = vld [vmem:[%s1675_s9 + $0x20] sm:$0xff]   ;;  %v1555_v14 = vld [vmem:[%s1675_s9 + $0x28] sm:$0xff]   ;;  %vm656_vm4 = vcmask 519552   ;;  %vm666_vm5 = vcmask 650752   ;;  %vm676_vm6 = vcmask 781952  }
  0x10   : > { %v1556_v15 = vld [vmem:[%s1675_s9 + $0x30] sm:$0xff]   ;;  %v1557_v16 = vld [vmem:[%s1675_s9 + $0x38] sm:$0xff]   ;;  %v1558_v17 = vld [vmem:[%s1675_s9 + $0x40] sm:$0xff]   ;;  %vm686_vm7 = vcmask 913152   ;;  %vm696_vm8 = vcmask 1044352   ;;  %s1943_s22 = smov (!%p262_p4, %s1654_s22), 1 }
  0x11   : > { %1475 = vmatpush3.bf16.msra.mxu0 %v1543_v2  ;;  %v1712_v19 = vld [vmem:[%s1935_s2] ss:$0 sm:$0xff]  ;;  %s1288_s16 = sshll.u32 %s1943_s22, 3 }
  0x12   : > { %1476 = vmatprep.subr.bf16.mxu0 %v1603_v1  ;;  %s265_s19 = scalar_lea.vmem %s1939_s6, %s1288_s16 }
  0x15   : > { %1477 = vmatpush3.bf16.msra.mxu0 %v1544_v3 }
  0x16   : > { %1478 = vmatprep.subr.bf16.mxu0 %v1603_v1 }
  0x19   : > { %1479 = vmatpush3.bf16.msra.mxu0 %v1545_v4 }
  0x1a   : > { %1480 = vmatprep.subr.bf16.mxu0 %v1603_v1 }
  0x1d   : > { %1481 = vmatpush3.bf16.msra.mxu0 %v1546_v5 }
  0x1e   : > { %1482 = vmatprep.subr.bf16.mxu0 %v1603_v1 }
  0x21   : > { %1483 = vmatpush3.bf16.msra.mxu0 %v1547_v6 }
  0x22   : > { %1484 = vmatprep.subr.bf16.mxu0 %v1603_v1 }
  0x25   : > { %1485 = vmatpush3.bf16.msra.mxu0 %v1548_v7 }
  0x26   : > { %1486 = vmatprep.subr.bf16.mxu0 %v1603_v1 }
  0x29   : > { %1487 = vmatpush3.bf16.msra.mxu0 %v1549_v8 }
  0x2c   : > { %1489 = vmatmul.mubr.bf16.vlgmr.msra.gmra.mxu0 %v1550_v9 }
  0x2d   : > { %1492 = vmatprep.mubr.msk.bf16.mxu0 %vm1604_vm0, %v1603_v1 }
  0x34   : > { %1493 = vmatmul.mubr.bf16.gmra.mxu0 %v1551_v10 }
  0x35   : > { %1496 = vmatprep.mubr.msk.bf16.mxu0 %vm1604_vm0, %v1603_v1 }
  0x3c   : > { %1497 = vmatmul.mubr.bf16.gmra.mxu0 %v1552_v11 }
  0x3d   : > { %1500 = vmatprep.mubr.msk.bf16.mxu0 %vm1604_vm0, %v1603_v1 }
  0x44   : > { %1501 = vmatmul.mubr.bf16.gmra.mxu0 %v1553_v12 }
  0x45   : > { %1504 = vmatprep.mubr.msk.bf16.mxu0 %vm1604_vm0, %v1603_v1 }
  0x4c   : > { %1505 = vmatmul.mubr.bf16.gmra.mxu0 %v1554_v13 }
  0x4d   : > { %1508 = vmatprep.mubr.msk.bf16.mxu0 %vm1604_vm0, %v1603_v1 }
  0x54   : > { %1509 = vmatmul.mubr.bf16.gmra.mxu0 %v1555_v14 }
  0x55   : > { %1512 = vmatprep.mubr.msk.bf16.mxu0 %vm1604_vm0, %v1603_v1 }
  0x5c   : > { %1513 = vmatmul.mubr.bf16.gmra.mxu0 %v1556_v15 }
  0x5d   : > { %1516 = vmatprep.mubr.msk.bf16.mxu0 %vm1604_vm0, %v1603_v1 }
  0x64   : > { %1517 = vmatmul.mubr.bf16.gmra.mxu0 %v1557_v16 }
  0x65   : > { %1520 = vmatprep.mubr.msk.bf16.mxu0 %vm1604_vm0, %v1603_v1 }
  0x6c   : > { %1521 = vmatmul.mubr.bf16.gmra.mxu0 %v1558_v17 }
  0xec   : > { %v444_v20 = vpop.f32.mrf.mxu0 }
  0xed   : > { %v445_v21 = vadd.f32 %v1712_v19, %v444_v20 }
  0xee   : > { %v1490_v22 = vpop.f32.mrf.mxu0 }
  0xef   : > { %v515_v23 = vmax.f32 %v445_v21, 0.0 }
  0xf0   : > { %v447_v24 = vpop.f32.mrf.mxu0 }
  0xf1   : > { %533 = vst [vmem:[%s1719_s28] sm:$0xff] %v515_v23  ;;  %v448_v25 = vadd.f32 %v1712_v19, %v447_v24 }
  0xf2   : > { %v1491_v26 = vpop.f32.mrf.mxu0 }
  0xf3   : > { %v516_v27 = vmax.f32 %v448_v25, 0.0 }
  0xf4   : > { %v452_v28 = vpop.f32.mrf.mxu0 }
  0xf5   : > { %534 = vst [vmem:[%s1719_s28 + $0x8] sm:$0xff] %v516_v27  ;;  %v453_v29 = vadd.f32 %v1712_v19, %v452_v28 }
  0xf6   : > { %v1494_v30 = vpop.f32.mrf.mxu0 }
  0xf7   : > { %v517_v31 = vmax.f32 %v453_v29, 0.0 }
  0xf8   : > { %v455_v32 = vpop.f32.mrf.mxu0 }
  0xf9   : > { %535 = vst [vmem:[%s1719_s28 + $0x10] sm:$0xff] %v517_v31  ;;  %v456_v33 = vadd.f32 %v1712_v19, %v455_v32 }
  0xfa   : > { %v1495_v34 = vpop.f32.mrf.mxu0 }
  0xfb   : > { %v518_v35 = vmax.f32 %v456_v33, 0.0 }
  0xfc   : > { %v460_v36 = vpop.f32.mrf.mxu0  ;;  %v551_v38 = vld [vmem:[%s1719_s28] ss:$2 sm:$0x3f]  ;;  %v1307_v39 = vld [vmem:[%s1719_s28 + $0x1] ss:$2 sm:$0x3f] }
  0xfd   : > { %536 = vst [vmem:[%s1719_s28 + $0x18] sm:$0xff] %v518_v35  ;;  %v461_v37 = vadd.f32 %v1712_v19, %v460_v36  ;;  %v554_v45 = vmax.f32 %v551_v38, %v1307_v39 }
  0xfe   : > { %v1498_v40 = vpop.f32.mrf.mxu0 }
  0xff   : > { %v519_v41 = vmax.f32 %v461_v37, 0.0 }
 0x100   : > { %v1308_v42 = vld [vmem:[%s1719_s28 + $0xc] ss:$2 sm:$0x3f]  ;;  %v1309_v43 = vld [vmem:[%s1719_s28 + $0xd] ss:$2 sm:$0x3f]  ;;  %v463_v44 = vpop.f32.mrf.mxu0 }
 0x101   : > { %v559_v46 = vmax.f32 %v1308_v42, %v1309_v43  ;;  %537 = vst [vmem:[%s1719_s28 + $0x20] sm:$0xff] %v519_v41  ;;  %v464_v47 = vadd.f32 %v1712_v19, %v463_v44 }
 0x102   : > { %v1499_v48 = vpop.f32.mrf.mxu0 }
 0x103   : > { %v520_v49 = vmax.f32 %v464_v47, 0.0  ;;  %v560_v50 = vmax.f32 %v554_v45, %v559_v46  ;;  %v1559_v46 = vld [vmem:[%s1936_s3 + $0x78] sm:$0xff]  }
 0x104   : > { %v468_v51 = vpop.f32.mrf.mxu0  ;;  %v1560_v47 = vld [vmem:[%s1936_s3 + $0x38] sm:$0xff]   ;;  %1428 = vmatprep.subr.bf16.mxu1 %v1559_v46 }
 0x105   : > { %538 = vst [vmem:[%s1719_s28 + $0x28] sm:$0xff] %v520_v49  ;;  %v469_v52 = vadd.f32 %v1712_v19, %v468_v51  ;;  %561 = vst [vmem:[#allocation2] sm:$0x3f] %v560_v50  ;;  %1429 = vmatpush3.bf16.msra.mxu1 %v1560_v47 }
 0x106   : > { %v1502_v53 = vpop.f32.mrf.mxu0 }
 0x107   : > { %v521_v54 = vmax.f32 %v469_v52, 0.0 }
 0x108   : > { %v471_v55 = vpop.f32.mrf.mxu0  ;;  %v1310_v57 = vld [vmem:[%s1719_s28 + $0x18] ss:$2 sm:$0x3f]  ;;  %v1311_v58 = vld [vmem:[%s1719_s28 + $0x19] ss:$2 sm:$0x3f] }
 0x109   : > { %539 = vst [vmem:[%s1719_s28 + $0x30] sm:$0xff] %v521_v54  ;;  %v472_v56 = vadd.f32 %v1712_v19, %v471_v55  ;;  %v566_v0 = vmax.f32 %v1310_v57, %v1311_v58 }
 0x10a   : > { %v1503_v59 = vpop.f32.mrf.mxu0 }
 0x10b   : > { %v522_v60 = vmax.f32 %v472_v56, 0.0 }
 0x10c   : > { %v1312_v61 = vld [vmem:[%s1719_s28 + $0x24] ss:$2 sm:$0x3f]  ;;  %v1313_v62 = vld [vmem:[%s1719_s28 + $0x25] ss:$2 sm:$0x3f]  ;;  %v476_v63 = vpop.f32.mrf.mxu0 }
 0x10d   : > { %v571_v1 = vmax.f32 %v1312_v61, %v1313_v62  ;;  %540 = vst [vmem:[%s1719_s28 + $0x38] sm:$0xff] %v522_v60  ;;  %v477_v2 = vadd.f32 %v1712_v19, %v476_v63  ;;  %v1561_v62 = vld [vmem:[%s1936_s3 + $0x70] sm:$0xff]  }
 0x10e   : > { %v1506_v3 = vpop.f32.mrf.mxu0  ;;  %v1562_v63 = vld [vmem:[%s1936_s3 + $0x30] sm:$0xff]   ;;  %1430 = vmatprep.subr.bf16.mxu1 %v1561_v62 }
 0x10f   : > { %v523_v4 = vmax.f32 %v477_v2, 0.0  ;;  %v572_v5 = vmax.f32 %v566_v0, %v571_v1  ;;  %1431 = vmatpush3.bf16.msra.mxu1 %v1562_v63 }
 0x110   : > { %v479_v6 = vpop.f32.mrf.mxu0 }
 0x111   : > { %541 = vst [vmem:[%s1719_s28 + $0x40] sm:$0xff] %v523_v4  ;;  %v480_v7 = vadd.f32 %v1712_v19, %v479_v6  ;;  %573 = vst [vmem:[#allocation2 + $0x6] sm:$0x3f] %v572_v5  ;;  %v1563_v6 = vld [vmem:[%s1936_s3 + $0x68] sm:$0xff]  }
 0x112   : > { %v1507_v8 = vpop.f32.mrf.mxu0  ;;  %1432 = vmatprep.subr.bf16.mxu1 %v1563_v6 }
 0x113   : > { %v524_v9 = vmax.f32 %v480_v7, 0.0  ;;  %v1564_v7 = vld [vmem:[%s1936_s3 + $0x28] sm:$0xff]  }
 0x114   : > { %v484_v10 = vpop.f32.mrf.mxu0  ;;  %v1314_v12 = vld [vmem:[%s1719_s28 + $0x30] ss:$2 sm:$0x3f]  ;;  %v1315_v13 = vld [vmem:[%s1719_s28 + $0x31] ss:$2 sm:$0x3f]  ;;  %1433 = vmatpush3.bf16.msra.mxu1 %v1564_v7 }
 0x115   : > { %542 = vst [vmem:[%s1719_s28 + $0x48] sm:$0xff] %v524_v9  ;;  %v485_v11 = vadd.f32 %v1712_v19, %v484_v10  ;;  %v578_v20 = vmax.f32 %v1314_v12, %v1315_v13 }
 0x116   : > { %v1510_v14 = vpop.f32.mrf.mxu0 }
 0x117   : > { %v525_v15 = vmax.f32 %v485_v11, 0.0 }
 0x118   : > { %v1316_v16 = vld [vmem:[%s1719_s28 + $0x3c] ss:$2 sm:$0x3f]  ;;  %v1317_v17 = vld [vmem:[%s1719_s28 + $0x3d] ss:$2 sm:$0x3f]  ;;  %v487_v18 = vpop.f32.mrf.mxu0 }
 0x119   : > { %v583_v21 = vmax.f32 %v1316_v16, %v1317_v17  ;;  %543 = vst [vmem:[%s1719_s28 + $0x50] sm:$0xff] %v525_v15  ;;  %v488_v22 = vadd.f32 %v1712_v19, %v487_v18  ;;  %v638_v23 = vld [vmem:[#allocation2 + $0x2] sm:$0xff] }
 0x11a   : > { %v628_v24 = vld [vmem:[#allocation2 + $0x1] sm:$0xff]  ;;  %v1511_v25 = vpop.f32.mrf.mxu0  ;;  %v1391_v26 = vpack.c.bf16 %v638_v23, %v638_v23 }
 0x11b   : > { %v1390_v27 = vpack.c.bf16 %v628_v24, %v628_v24  ;;  %v624_v28 = vld [vmem:[#allocation2] sm:$0xff]  ;;  %v526_v29 = vmax.f32 %v488_v22, 0.0  ;;  %v584_v31 = vmax.f32 %v578_v20, %v583_v21 }
 0x11c   : > { %v648_v30 = vld [vmem:[#allocation2 + $0x3] sm:$0xff]  ;;  %v625_v32 = vpack.c.bf16 %v624_v28, %v624_v28  ;;  %643 = vrot.lane.b32.xlu1 %v1391_v26, %s1606_s27  ;;  %v492_v33 = vpop.f32.mrf.mxu0 }
 0x11d   : > { %633 = vrot.lane.b32.xlu0 %v1390_v27, %s1607_s29  ;;  %544 = vst [vmem:[%s1719_s28 + $0x58] sm:$0xff] %v526_v29  ;;  %v493_v34 = vadd.f32 %v1712_v19, %v492_v33  ;;  %585 = vst [vmem:[#allocation2 + $0xc] sm:$0x3f] %v584_v31  ;;  %v1392_v36 = vpack.c.bf16 %v648_v30, %v648_v30  ;;  %v658_v38 = vld [vmem:[#allocation2 + $0x4] sm:$0xff]  ;;  %v1568_v33 = vld [vmem:[%s1936_s3 + $0x18] sm:$0xff]  }
 0x11e   : > { %627 = vst.msk [vmem:[#allocation3] sm:$0xf] %vm626_vm1, %v625_v32  ;;  %v1514_v35 = vpop.f32.mrf.mxu0  ;;  %v1393_v44 = vpack.c.bf16 %v658_v38, %v658_v38  ;;  %v1565_v17 = vld [vmem:[%s1936_s3 + $0x60] sm:$0xff]   ;;  %v1567_v32 = vld [vmem:[%s1936_s3 + $0x58] sm:$0xff]  }
 0x11f   : > { %v527_v37 = vmax.f32 %v493_v34, 0.0  ;;  %v1566_v18 = vld [vmem:[%s1936_s3 + $0x20] sm:$0xff]   ;;  %1434 = vmatprep.subr.bf16.mxu1 %v1565_v17  ;;  %v1569_v35 = vld [vmem:[%s1936_s3 + $0x50] sm:$0xff]  }
 0x120   : > { %v495_v39 = vpop.f32.mrf.mxu0  ;;  %v1318_v41 = vld [vmem:[%s1719_s28 + $0x48] ss:$2 sm:$0x3f]  ;;  %v1319_v42 = vld [vmem:[%s1719_s28 + $0x49] ss:$2 sm:$0x3f]  ;;  %1435 = vmatpush3.bf16.msra.mxu1 %v1566_v18 }
 0x121   : > { %653 = vrot.lane.b32.xlu0 %v1392_v36, %s1608_s30  ;;  %545 = vst [vmem:[%s1719_s28 + $0x60] sm:$0xff] %v527_v37  ;;  %v496_v40 = vadd.f32 %v1712_v19, %v495_v39  ;;  %v590_v51 = vmax.f32 %v1318_v41, %v1319_v42  ;;  %1436 = vmatprep.subr.bf16.mxu1 %v1567_v32  ;;  %v1570_v36 = vld [vmem:[%s1936_s3 + $0x10] sm:$0xff]   ;;  %v1571_v41 = vld [vmem:[%s1936_s3 + $0x48] sm:$0xff]  }
 0x122   : > { %v1515_v43 = vpop.f32.mrf.mxu0  ;;  %v1572_v42 = vld [vmem:[%s1936_s3 + $0x8] sm:$0xff]  }
 0x123   : > { %v528_v45 = vmax.f32 %v496_v40, 0.0 }
 0x124   : > { %v1320_v48 = vld [vmem:[%s1719_s28 + $0x54] ss:$2 sm:$0x3f]  ;;  %v1321_v49 = vld [vmem:[%s1719_s28 + $0x55] ss:$2 sm:$0x3f]  ;;  %v500_v50 = vpop.f32.mrf.mxu0  ;;  %1437 = vmatpush3.bf16.msra.mxu1 %v1568_v33 }
 0x125   : > { %663 = vrot.lane.b32.xlu0 %v1393_v44, %s1609_s11  ;;  %v595_v52 = vmax.f32 %v1320_v48, %v1321_v49  ;;  %546 = vst [vmem:[%s1719_s28 + $0x68] sm:$0xff] %v528_v45  ;;  %v501_v53 = vadd.f32 %v1712_v19, %v500_v50  ;;  %v701_v54 = vld [vmem:[#allocation2 + $0xa] sm:$0xff]  ;;  %1438 = vmatprep.subr.bf16.mxu1 %v1569_v35  ;;  %v1578_v33 = vld [vmem:[%s1936_s3 + $0xb8] sm:$0xff]  }
 0x126   : > { %v1518_v55 = vpop.f32.mrf.mxu0  ;;  %v1397_v56 = vpack.c.bf16 %v701_v54, %v701_v54  ;;  %v698_v57 = vld [vmem:[#allocation2 + $0x9] sm:$0xff] }
 0x127   : > { %v529_v58 = vmax.f32 %v501_v53, 0.0  ;;  %v668_v59 = vld [vmem:[#allocation2 + $0x6] sm:$0xff]  ;;  %v596_v60 = vmax.f32 %v590_v51, %v595_v52  ;;  %v699_v61 = vpack.c.bf16 %v698_v57, %v698_v57 }
 0x128   : > { %v503_v0 = vpop.f32.mrf.mxu0  ;;  %v1394_v3 = vpack.c.bf16 %v668_v59, %v668_v59  ;;  %v678_v5 = vld [vmem:[#allocation2 + $0x7] sm:$0xff]  ;;  %1439 = vmatpush3.bf16.msra.mxu1 %v1570_v36  ;;  %v1580_v36 = vld [vmem:[%s1936_s3 + $0xb0] sm:$0xff]  }
 0x129   : > { %706 = vrot.lane.b32.xlu0 %v1397_v56, %s1607_s29  ;;  %547 = vst [vmem:[%s1719_s28 + $0x70] sm:$0xff] %v529_v58  ;;  %v504_v1 = vadd.f32 %v1712_v19, %v503_v0  ;;  %597 = vst [vmem:[#allocation2 + $0x12] sm:$0x3f] %v596_v60  ;;  %v1395_v13 = vpack.c.bf16 %v678_v5, %v678_v5  ;;  %v688_v16 = vld [vmem:[#allocation2 + $0x8] sm:$0xff]  ;;  %1440 = vmatprep.subr.bf16.mxu1 %v1571_v41  ;;  %v1573_v55 = vld [vmem:[%s1936_s3 + $0x40] sm:$0xff]  }
 0x12a   : > { %700 = vst.msk [vmem:[#allocation3 + $0x4] sm:$0xf] %vm626_vm1, %v699_v61  ;;  %v1519_v2 = vpop.f32.mrf.mxu0  ;;  %v1396_v26 = vpack.c.bf16 %v688_v16, %v688_v16  ;;  %v1574_v56 = vld [vmem:[%s1936_s3] sm:$0xff]   ;;  %v1577_v60 = vld [vmem:[%s1936_s3 + $0xf8] sm:$0xff]  }
 0x12b   : > { %v530_v4 = vmax.f32 %v504_v1, 0.0 }
 0x12c   : > { %v1322_v8 = vld [vmem:[%s1719_s28 + $0x60] ss:$2 sm:$0x3f]  ;;  %v1323_v9 = vld [vmem:[%s1719_s28 + $0x61] ss:$2 sm:$0x3f]  ;;  %v508_v10 = vpop.f32.mrf.mxu0  ;;  %1441 = vmatpush3.bf16.msra.mxu1 %v1572_v42 }
 0x12d   : > { %673 = vrot.lane.b32.xlu0 %v1394_v3, %s1610_s20  ;;  %548 = vst [vmem:[%s1719_s28 + $0x78] sm:$0xff] %v530_v4  ;;  %v509_v11 = vadd.f32 %v1712_v19, %v508_v10  ;;  %v602_v14 = vmax.f32 %v1322_v8, %v1323_v9  ;;  %1442 = vmatprep.subr.bf16.mxu1 %v1573_v55 }
 0x12e   : > { %v1522_v12 = vpop.f32.mrf.mxu0 }
 0x12f   : > { %v531_v15 = vmax.f32 %v509_v11, 0.0 }
 0x130   : > { %v1324_v20 = vld [vmem:[%s1719_s28 + $0x6c] ss:$2 sm:$0x3f]  ;;  %v1325_v21 = vld [vmem:[%s1719_s28 + $0x6d] ss:$2 sm:$0x3f]  ;;  %v511_v22 = vpop.f32.mrf.mxu0  ;;  %1443 = vmatpush3.bf16.msra.mxu1 %v1574_v56 }
 0x131   : > { %683 = vrot.lane.b32.xlu0 %v1395_v13, %s1611_s7  ;;  %v607_v23 = vmax.f32 %v1324_v20, %v1325_v21  ;;  %549 = vst [vmem:[%s1719_s28 + $0x80] sm:$0xff] %v531_v15  ;;  %v512_v24 = vadd.f32 %v1712_v19, %v511_v22  ;;  %v710_v25 = vld [vmem:[#allocation2 + $0xc] sm:$0xff]  ;;  %1450 = vmatprep.subr.bf16.mxu1 %v1577_v60 }
 0x132   : > { %v1398_v27 = vpack.c.bf16 %v710_v25, %v710_v25  ;;  %v1523_v28 = vpop.f32.mrf.mxu0  ;;  %v719_v30 = vld [vmem:[#allocation2 + $0xd] sm:$0xff] }
 0x133   : > { %v532_v29 = vmax.f32 %v512_v24, 0.0  ;;  %v608_v31 = vmax.f32 %v602_v14, %v607_v23  ;;  %v1399_v19 = vpack.c.bf16 %v719_v30, %v719_v30  ;;  %v728_v34 = vld [vmem:[#allocation2 + $0xe] sm:$0xff] }
 0x134   : > { %715 = vrot.lane.b32.xlu1 %v1398_v27, %s1606_s27  ;;  %v1400_v39 = vpack.c.bf16 %v728_v34, %v728_v34  ;;  %v737_v40 = vld [vmem:[#allocation2 + $0xf] sm:$0xff] }
 0x135   : > { %693 = vrot.lane.b32.xlu0 %v1396_v26, %s1612_s13  ;;  %550 = vst [vmem:[%s1719_s28 + $0x88] sm:$0xff] %v532_v29  ;;  %609 = vst [vmem:[#allocation2 + $0x18] sm:$0x3f] %v608_v31  ;;  %v1401_v48 = vpack.c.bf16 %v737_v40, %v737_v40  ;;  %v746_v51 = vld [vmem:[#allocation2 + $0x10] sm:$0xff]  ;;  %v1584_v40 = vld [vmem:[%s1936_s3 + $0xa0] sm:$0xff]  }
 0x136   : > { %v1402_v57 = vpack.c.bf16 %v746_v51, %v746_v51 }
 0x138   : > { %724 = vrot.lane.b32.xlu1 %v1399_v19, %s1608_s30  ;;  %v1326_v37 = vld [vmem:[%s1719_s28 + $0x78] ss:$2 sm:$0x3f]  ;;  %v1327_v38 = vld [vmem:[%s1719_s28 + $0x79] ss:$2 sm:$0x3f] }
 0x139   : > { %v614_v45 = vmax.f32 %v1326_v37, %v1327_v38  ;;  %v1579_v19 = vld [vmem:[%s1936_s3 + $0xf0] sm:$0xff]   ;;  %v1581_v37 = vld [vmem:[%s1936_s3 + $0xe8] sm:$0xff]  }
 0x13a   : > { %v1582_v38 = vld [vmem:[%s1936_s3 + $0xa8] sm:$0xff]  }
 0x13c   : > { %v1328_v43 = vld [vmem:[%s1719_s28 + $0x84] ss:$2 sm:$0x3f]  ;;  %v1329_v44 = vld [vmem:[%s1719_s28 + $0x85] ss:$2 sm:$0x3f]  ;;  %733 = vrot.lane.b32.xlu1 %v1400_v39, %s1609_s11 }
 0x13d   : > { %v619_v46 = vmax.f32 %v1328_v43, %v1329_v44  ;;  %v767_v47 = vld [vmem:[#allocation2 + $0x14] sm:$0xff]  ;;  %v1583_v39 = vld [vmem:[%s1936_s3 + $0xe0] sm:$0xff]  }
 0x13e   : > { %v1404_v49 = vpack.c.bf16 %v767_v47, %v767_v47  ;;  %v764_v50 = vld [vmem:[#allocation2 + $0x13] sm:$0xff]  ;;  %v1591_v47 = vld [vmem:[%s1936_s3 + $0xc8] sm:$0xff]  }
 0x13f   : > { %v785_v52 = vld [vmem:[#allocation2 + $0x16] sm:$0xff]  ;;  %v620_v53 = vmax.f32 %v614_v45, %v619_v46  ;;  %v765_v54 = vpack.c.bf16 %v764_v50, %v764_v50  ;;  %v1594_v50 = vld [vmem:[%s1936_s3 + $0x80] sm:$0xff]  }
 0x140   : > { %742 = vrot.lane.b32.xlu1 %v1401_v48, %s1610_s20  ;;  %772 = vrot.lane.b32.xlu0 %v1404_v49, %s1607_s29  ;;  %v1406_v58 = vpack.c.bf16 %v785_v52, %v785_v52  ;;  %v755_v59 = vld [vmem:[#allocation2 + $0x12] sm:$0xff]  ;;  %v1592_v48 = vld [vmem:[%s1936_s3 + $0x88] sm:$0xff]   ;;  %v1593_v49 = vld [vmem:[%s1936_s3 + $0xc0] sm:$0xff]  }
 0x141   : > { %621 = vst [vmem:[#allocation2 + $0x1e] sm:$0x3f] %v620_v53  ;;  %766 = vst.msk [vmem:[#allocation3 + $0x8] sm:$0xf] %vm626_vm1, %v765_v54  ;;  %v1403_v61 = vpack.c.bf16 %v755_v59, %v755_v59  ;;  %v776_v62 = vld [vmem:[#allocation2 + $0x15] sm:$0xff] }
 0x142   : > { %v1405_v2 = vpack.c.bf16 %v776_v62, %v776_v62  ;;  %v1587_v43 = vld [vmem:[%s1936_s3 + $0xd8] sm:$0xff]   ;;  %v1589_v45 = vld [vmem:[%s1936_s3 + $0xd0] sm:$0xff]  }
 0x143   : > { %v1588_v44 = vld [vmem:[%s1936_s3 + $0x98] sm:$0xff]   ;;  %v1590_v46 = vld [vmem:[%s1936_s3 + $0x90] sm:$0xff]  }
 0x144   : > { %751 = vrot.lane.b32.xlu1 %v1402_v57, %s1611_s7  ;;  %790 = vrot.lane.b32.xlu0 %v1406_v58, %s1608_s30  ;;  %v1351_v57 = vld [vmem:[%s1937_s4] ss:$0 sm:$0xff] }
 0x148   : > { %760 = vrot.lane.b32.xlu1 %v1403_v61, %s1612_s13  ;;  %v803_v63 = vld [vmem:[#allocation2 + $0x19] sm:$0xff] }
 0x149   : > { %v1408_v0 = vpack.c.bf16 %v803_v63, %v803_v63  ;;  %v830_v1 = vld [vmem:[#allocation2 + $0x1c] sm:$0xff] }
 0x14a   : > { %v821_v3 = vld [vmem:[#allocation2 + $0x1b] sm:$0xff]  ;;  %v831_v4 = vpack.c.bf16 %v830_v1, %v830_v1 }
 0x14b   : > { %808 = vrot.lane.b32.xlu0 %v1408_v0, %s1610_s20  ;;  %v794_v5 = vld [vmem:[#allocation2 + $0x18] sm:$0xff]  ;;  %v1410_v6 = vpack.c.bf16 %v821_v3, %v821_v3 }
 0x14c   : > { %781 = vrot.lane.b32.xlu1 %v1405_v2, %s1606_s27  ;;  %832 = vst.msk [vmem:[#allocation3 + $0xc] sm:$0xf] %vm626_vm1, %v831_v4  ;;  %v1407_v7 = vpack.c.bf16 %v794_v5, %v794_v5  ;;  %v812_v8 = vld [vmem:[#allocation2 + $0x1a] sm:$0xff] }
 0x14d   : > { %v1409_v9 = vpack.c.bf16 %v812_v8, %v812_v8 }
 0x14f   : > { %826 = vrot.lane.b32.xlu0 %v1410_v6, %s1612_s13 }
 0x150   : > { %799 = vrot.lane.b32.xlu1 %v1407_v7, %s1609_s11 }
 0x154   : > { %817 = vrot.lane.b32.xlu1 %v1409_v9, %s1611_s7 }
 0x18e   : > { %v644_v10 = vpop.permute.xlu1 %643 }
 0x18f   : > { %v634_v11 = vpop.permute.xlu0 %633 }
 0x190   : > { %637 = vst.msk [vmem:[#allocation3] sm:$0xf] %vm636_vm2, %v634_v11 }
 0x191   : > { %647 = vst.msk [vmem:[#allocation3] sm:$0xf] %vm646_vm3, %v644_v10 }
 0x193   : > { %v654_v12 = vpop.permute.xlu0 %653 }
 0x194   : > { %657 = vst.msk [vmem:[#allocation3] sm:$0xf] %vm656_vm4, %v654_v12 }
 0x197   : > { %v664_v13 = vpop.permute.xlu0 %663 }
 0x198   : > { %667 = vst.msk [vmem:[#allocation3] sm:$0xf] %vm666_vm5, %v664_v13 }
 0x19b   : > { %v707_v14 = vpop.permute.xlu0 %706 }
 0x19c   : > { %709 = vst.msk [vmem:[#allocation3 + $0x4] sm:$0xf] %vm636_vm2, %v707_v14 }
 0x19f   : > { %v674_v15 = vpop.permute.xlu0 %673 }
 0x1a0   : > { %677 = vst.msk [vmem:[#allocation3] sm:$0xf] %vm676_vm6, %v674_v15 }
 0x1a3   : > { %v684_v16 = vpop.permute.xlu0 %683 }
 0x1a4   : > { %687 = vst.msk [vmem:[#allocation3] sm:$0xf] %vm686_vm7, %v684_v16 }
 0x1a6   : > { %v716_v18 = vpop.permute.xlu1 %715 }
 0x1a7   : > { %v694_v17 = vpop.permute.xlu0 %693  ;;  %718 = vst.msk [vmem:[#allocation3 + $0x4] sm:$0xf] %vm646_vm3, %v716_v18 }
 0x1a8   : > { %697 = vst.msk [vmem:[#allocation3] sm:$0xf] %vm696_vm8, %v694_v17 }
 0x1aa   : > { %v725_v20 = vpop.permute.xlu1 %724 }
 0x1ab   : > { %727 = vst.msk [vmem:[#allocation3 + $0x4] sm:$0xf] %vm656_vm4, %v725_v20 }
 0x1ae   : > { %v734_v21 = vpop.permute.xlu1 %733 }
 0x1af   : > { %736 = vst.msk [vmem:[#allocation3 + $0x4] sm:$0xf] %vm666_vm5, %v734_v21 }
 0x1b2   : > { %v743_v22 = vpop.permute.xlu1 %742  ;;  %v773_v23 = vpop.permute.xlu0 %772 }
 0x1b3   : > { %745 = vst.msk [vmem:[#allocation3 + $0x4] sm:$0xf] %vm676_vm6, %v743_v22 }
 0x1b4   : > { %775 = vst.msk [vmem:[#allocation3 + $0x8] sm:$0xf] %vm636_vm2, %v773_v23 }
 0x1b6   : > { %v752_v24 = vpop.permute.xlu1 %751  ;;  %v791_v26 = vpop.permute.xlu0 %790 }
 0x1b7   : > { %754 = vst.msk [vmem:[#allocation3 + $0x4] sm:$0xf] %vm686_vm7, %v752_v24 }
 0x1ba   : > { %v761_v25 = vpop.permute.xlu1 %760 }
 0x1bb   : > { %763 = vst.msk [vmem:[#allocation3 + $0x4] sm:$0xf] %vm696_vm8, %v761_v25 }
 0x1bd   : > { %v809_v28 = vpop.permute.xlu0 %808 }
 0x1be   : > { %v782_v27 = vpop.permute.xlu1 %781 }
 0x1bf   : > { %784 = vst.msk [vmem:[#allocation3 + $0x8] sm:$0xf] %vm646_vm3, %v782_v27 }
 0x1c0   : > { %793 = vst.msk [vmem:[#allocation3 + $0x8] sm:$0xf] %vm656_vm4, %v791_v26 }
 0x1c1   : > { %v827_v35 = vpop.permute.xlu0 %826 }
 0x1c2   : > { %v800_v29 = vpop.permute.xlu1 %799  ;;  %v833_v30 = vld [vmem:[#allocation3] sm:$0xff] }
 0x1c3   : > { %802 = vst.msk [vmem:[#allocation3 + $0x8] sm:$0xf] %vm666_vm5, %v800_v29  ;;  %v1352_v31 = vcombine.low %v833_v30, %v833_v30  ;;  %v1353_v32 = vcombine.high %v833_v30, %v833_v30 }
 0x1c4   : > { %811 = vst.msk [vmem:[#allocation3 + $0x8] sm:$0xf] %vm676_vm6, %v809_v28 }
 0x1c5   : > { %1144 = vmatprep.mubr.bf16.mxu1 %v1353_v32 }
 0x1c6   : > { %1145 = vmatmul.mubr.bf16.vlgmr.msra.gmra.mxu1 %v1352_v31  ;;  %v818_v34 = vpop.permute.xlu1 %817 }
 0x1c7   : > { %1451 = vmatpush3.bf16.msra.mxu1 %v1578_v33  ;;  %820 = vst.msk [vmem:[#allocation3 + $0x8] sm:$0xf] %vm686_vm7, %v818_v34 }
 0x1c8   : > { %829 = vst.msk [vmem:[#allocation3 + $0x8] sm:$0xf] %vm696_vm8, %v827_v35  ;;  %1452 = vmatprep.subr.bf16.mxu1 %v1579_v19 }
 0x1cb   : > { %1453 = vmatpush3.bf16.msra.mxu1 %v1580_v36 }
 0x1cc   : > { %1454 = vmatprep.subr.bf16.mxu1 %v1581_v37 }
 0x1cf   : > { %1455 = vmatpush3.bf16.msra.mxu1 %v1582_v38  ;;  %v834_v41 = vld [vmem:[#allocation3 + $0x8] sm:$0xff] }
 0x1d0   : > { %1456 = vmatprep.subr.bf16.mxu1 %v1583_v39  ;;  %v1355_v42 = vcombine.high %v834_v41, %v834_v41  ;;  %v1354_v51 = vcombine.low %v834_v41, %v834_v41 }
 0x1d2   : > { %1184 = vmatprep.mubr.bf16.mxu1 %v1355_v42 }
 0x1d3   : > { %1457 = vmatpush3.bf16.msra.mxu1 %v1584_v40 }
 0x1d4   : > { %1458 = vmatprep.subr.bf16.mxu1 %v1587_v43 }
 0x1d7   : > { %1459 = vmatpush3.bf16.msra.mxu1 %v1588_v44 }
 0x1d8   : > { %1460 = vmatprep.subr.bf16.mxu1 %v1589_v45 }
 0x1db   : > { %1461 = vmatpush3.bf16.msra.mxu1 %v1590_v46 }
 0x1dc   : > { %1462 = vmatprep.subr.bf16.mxu1 %v1591_v47 }
 0x1df   : > { %1463 = vmatpush3.bf16.msra.mxu1 %v1592_v48 }
 0x1e0   : > { %1464 = vmatprep.subr.bf16.mxu1 %v1593_v49 }
 0x1e3   : > { %1465 = vmatpush3.bf16.msra.mxu1 %v1594_v50 }
 0x1e6   : > { %1185 = vmatmul.mubr.bf16.vlgmr.msra.gmra.mxu1 %v1354_v51 }
 0x286   : > { %v1444_v52 = vpop.f32.mrf.mxu1 }
 0x288   : > { %v1445_v53 = vpop.f32.mrf.mxu1 }
 0x289   : > { %v1446_v56 = vadd.f32 %v1445_v53, %v1444_v52 }
 0x28a   : > { %v1447_v54 = vpop.f32.mrf.mxu1 }
 0x28b   : > { %v1147_v60 = vadd.f32 %v1446_v56, %v1351_v57 }
 0x28c   : > { %v1448_v55 = vpop.f32.mrf.mxu1 }
 0x2a6   : > { %v1466_v58 = vpop.f32.mrf.mxu1 }
 0x2a8   : > { %v1467_v59 = vpop.f32.mrf.mxu1 }
 0x2a9   : > { %v1468_v61 = vadd.f32 %v1467_v59, %v1466_v58 }
 0x2aa   : > { %v1469_v62 = vpop.f32.mrf.mxu1 }
 0x2ab   : > { %v1187_v63 = vadd.f32 %v1468_v61, %v1147_v60 }
 0x2ac   : > { %v1470_v0 = vpop.f32.mrf.mxu1 }
 0x2ad   : > { %v1192_v1 = vmax.f32 %v1187_v63, 0.0 }
 0x2af   : > { %1193 = vst [vmem:[%s265_s19] sm:$0xff] %v1192_v1 }
 0x2b0 PF: > { %s17_s21 = sadd.s32 1, %s1601_s21  }
 0x2b1   : > { %p14_p5 = scmp.ge.s32.totalorder %s17_s21, 4  }
 0x2b3   :  { %16 = sbr.rel (!%p14_p5) target bundleno = 1 (0x1), region = 105 }

</bundles_post_ra>
